<compile_context>
chip_gen: v7x
topology: tpu7x:2x2x1
jax: 0.10.0
libtpu: 0.0.40
codegen_flags: <defaults>
</compile_context>

<pallas_src>
import math

import jax
import jax.numpy as jnp
from jax.experimental import pallas as pl
from jax.experimental.pallas import tpu as pltpu


def _resolve_shape(target_shape, n):
    """Resolve a torch-style view shape (may contain one -1) to a concrete tuple."""
    shape = tuple(int(s) for s in target_shape)
    if shape.count(-1) > 1:
        raise ValueError("view(): only one dimension can be inferred (-1)")
    if -1 in shape:
        known = 1
        for s in shape:
            if s != -1:
                known *= s
        if known == 0 or n % known != 0:
            raise ValueError(
                f"view(): cannot infer -1 in shape {target_shape} for {n} elements")
        shape = tuple(n // known if s == -1 else s for s in shape)
    if math.prod(shape) != n:
        raise ValueError(
            f"view(): target shape {target_shape} is invalid for {n} elements")
    return shape


def _hbm_copy_kernel(x_hbm, o_hbm, sem):
    # Single HBM->HBM DMA: no VMEM staging, no (8,128) constraint, no grid.
    cp = pltpu.make_async_copy(x_hbm, o_hbm, sem)
    cp.start()
    cp.wait()


def _pallas_copy(x):
    """Explicit physical copy of `x` via one HBM->HBM DMA in a Pallas kernel."""
    n = x.size
    itemsize = jnp.dtype(x.dtype).itemsize
    return pl.pallas_call(
        _hbm_copy_kernel,
        out_shape=jax.ShapeDtypeStruct(x.shape, x.dtype),
        in_specs=[pl.BlockSpec(memory_space=pl.ANY)],
        out_specs=pl.BlockSpec(memory_space=pl.ANY),
        scratch_shapes=[pltpu.SemaphoreType.DMA],
        compiler_params=pltpu.CompilerParams(has_side_effects=True),
        cost_estimate=pl.CostEstimate(
            flops=0, transcendentals=0, bytes_accessed=2 * n * itemsize),
    )(x)


def reshape_pallas(x, target_shape, *, copy=False):
    """Equivalent of torch.Tensor.view(target_shape).

    Default: metadata-only reshape (no kernel, no HBM traffic).
    copy=True: route the element copy through a Pallas HBM->HBM DMA kernel.
    """
    n = x.size
    shape = _resolve_shape(target_shape, n)

    if not copy or n == 0 or len(shape) == 0:
        # Fast path: contiguous row-major reshape is metadata-only.  Zero-size
        # and rank-0 targets also take this path (a DMA for them is pointless).
        return jnp.reshape(x, shape)

    # Explicit-copy path: metadata reshape to the final shape, then one direct
    # HBM->HBM DMA inside the kernel -- the kernel's output IS the module output.
    x_t = jnp.reshape(x, shape)  # metadata-only flatten/unflatten
    # TODO(synk): a donate/in-place mode (input_output_aliases={0: 0}) would
    # degenerate to the metadata-only fast path above (torch .view aliasing
    # semantics), so it is intentionally not wired through the DMA kernel
    # (src == dst self-copy would be pure overhead).
    return _pallas_copy(x_t)


class ReshapeModule:
    """Mirror of the PyTorch nn.Module `Reshape` (forward = x.view(self.shape)).

    By default the forward is the metadata-only fast path; construct with
    copy=True to force a fresh buffer via the Pallas HBM->HBM DMA kernel.
    """

    def __init__(self, *args, copy=False):
        self.shape = args
        self.copy = copy

    def __call__(self, x):
        return reshape_pallas(x, self.shape, copy=self.copy)


if __name__ == "__main__":
    key = jax.random.PRNGKey(0)

    # NCHW input, small shapes: batch=2, channels=4, spatial=16x16
    x = jax.random.normal(key, (2, 4, 16, 16), dtype=jnp.float32)
    ref_flat = x.reshape(2, 4 * 16 * 16)

    # 1) Default (fast) path: metadata-only, no kernel, no HBM traffic.
    mod = ReshapeModule(2, 4 * 16 * 16)
    out = jax.block_until_ready(mod(x))
    assert out.shape == (2, 1024) and out.dtype == x.dtype
    assert bool(jnp.array_equal(out, ref_flat))

    # 2) -1 inference on the fast path, like torch .view(-1, 16, 16)
    mod2 = ReshapeModule(-1, 16, 16)
    out2 = jax.block_until_ready(mod2(x))
    assert out2.shape == (8, 16, 16)
    assert bool(jnp.array_equal(out2, x.reshape(-1, 16, 16)))

    # 3) Explicit-copy path: exercises the Pallas HBM->HBM DMA kernel.
    mod3 = ReshapeModule(2, 4 * 16 * 16, copy=True)
    out3 = jax.block_until_ready(mod3(x))
    assert out3.shape == (2, 1024) and out3.dtype == x.dtype
    assert bool(jnp.array_equal(out3, ref_flat))

    # 4) Copy path with -1 inference and a non-lane-dense target (last dim 16):
    #    the direct DMA has no (8,128) constraint, so no fallback divergence.
    mod4 = ReshapeModule(-1, 16, 16, copy=True)
    out4 = jax.block_until_ready(mod4(x))
    assert out4.shape == (8, 16, 16)
    assert bool(jnp.array_equal(out4, x.reshape(-1, 16, 16)))

    print("KERNEL_OK")
</pallas_src>

<mosaic_0001>
module attributes {stable_mosaic.version = 11 : i64} {
  func.func @_hbm_copy_kernel(%arg0: memref<2x1024xf32, #tpu.memory_space<any>>, %arg1: memref<2x1024xf32, #tpu.memory_space<any>>, %arg2: memref<!tpu.dma_semaphore, #tpu.memory_space<semaphore_mem>>) attributes {dimension_semantics = [], scalar_prefetch = 0 : i64, scratch_operands = 1 : i64, tpu.core_type = #tpu.core_type<tc>} {
    tpu.enqueue_dma source(%arg0 : memref<2x1024xf32, #tpu.memory_space<any>>) target(%arg1 : memref<2x1024xf32, #tpu.memory_space<any>>) target_semaphore(%arg2 : memref<!tpu.dma_semaphore, #tpu.memory_space<semaphore_mem>>)
    tpu.wait_dma2 semaphore(%arg2 : memref<!tpu.dma_semaphore, #tpu.memory_space<semaphore_mem>>) src(%arg0 : memref<2x1024xf32, #tpu.memory_space<any>>) dst(%arg1 : memref<2x1024xf32, #tpu.memory_space<any>>)
    return
  }
}

</mosaic_0001>

<bundles_post_ra>
// kernel: tpu_custom_call.1
= control target key start
LH: loop header
LB: loop body
LE: loop exit
PB: predicated region body
PF: predicated region fallthrough
CT: control target
= control target key end

     0   :  { %s35_s6 = smov [#allocation2]   ;;  %s36_s7 = smov [#allocation3]   ;;  %s54_s0 = inlined_call_operand.hbm [shape: f32[2,1024], index: 0, kind: input, shape index: {}]   ;;  %s55_s1 = inlined_call_operand.hbm [shape: f32[2,1024], index: 1, kind: output, shape index: {}]  }
   0x1   :  { %s37_s8 = smov 0  }
   0x2   :  { %18 = dma.general %s54_s0, 256, %s55_s1, %s35_s6, %s36_s7, [#allocation4], %s37_s8, 0  }
   0x3   :  { %33 = dma.done.wait [#allocation2], 256 }
   0x4   :  { %34 = vsyncadd [#allocation2], 4294967040 }
   0x5   :  { %23 = vsyncmov [#allocation2] }
   0x8   :  { %s24_s13 = vpop.sfrf %23 }
   0x9   :  { %p29_p0 = scmp.ne.s32.totalorder %s24_s13, 0 }
   0xb   :  { %28 = shalt.err (%p29_p0)  }

</bundles_post_ra>
